<compile_context>
chip_gen: v6e
topology: v6e:2x2x1
jax: 0.10.0
libtpu: 0.0.40
codegen_flags: <defaults>
</compile_context>

<pallas_src>
import math

import jax
import jax.numpy as jnp
from jax.experimental import pallas as pl
from jax.experimental.pallas import tpu as pltpu


_TARGET_BLOCK_BYTES = 2 << 20          # ~2 MiB per x block (amortizes per-step overhead)
_SMALL_SLAB_BYTES = 1 << 20            # below this, span batch instead of rows
_VMEM_LIMIT_BYTES = 32 * 1024 * 1024   # explicit guard: > v5e's 16 MiB default, <= v7x physical


def make_positional_encoding(embed_size: int, max_length: int) -> jnp.ndarray:
    """Replicates PositionalEmbedding.get_positional_encoding -> (1, max_length, embed_size)."""
    assert embed_size % 2 == 0, "embed_size must be even (same limitation as the PyTorch module)"
    position = jnp.arange(0, max_length, dtype=jnp.float32)[:, None]            # (L, 1)
    division_term = jnp.exp(
        jnp.arange(0, embed_size, 2, dtype=jnp.float32)
        * (-math.log(10000.0) / embed_size)
    )                                                                             # (E/2,)
    angles = position * division_term                                             # (L, E/2)
    pe = jnp.zeros((max_length, embed_size), dtype=jnp.float32)
    pe = pe.at[:, 0::2].set(jnp.sin(angles))
    pe = pe.at[:, 1::2].set(jnp.cos(angles))
    return pe[None, :, :]                                                         # (1, L, E)


def _sublane_multiple(dtype) -> int:
    """Minimum sublane tile for this dtype (f32: 8, bf16: 16, int8/fp8: 32)."""
    itemsize = jnp.dtype(dtype).itemsize
    if itemsize >= 4:
        return 8
    if itemsize == 2:
        return 16
    return 32


def _add_pe_kernel(x_ref, pe_ref, o_ref):
    # Row-tiled paths: x/pe/out are all (rows, lanes) -> identical vreg shapes.
    # Batch-spanning path: x/out are (tile_b, R, 128), pe is (R, 128) -> jnp broadcast.
    o_ref[...] = x_ref[...] + pe_ref[...]


def positional_embedding_forward(inputs: jnp.ndarray, pe: jnp.ndarray) -> jnp.ndarray:
    """inputs: (B, L, E); pe: (1, max_length, E). Returns inputs + pe[:, :L, :]."""
    B, L, E = inputs.shape
    max_length = pe.shape[1]
    if L > max_length:
        raise ValueError(f"sequence length {L} exceeds max_length {max_length}")

    dtype = inputs.dtype
    itemsize = jnp.dtype(dtype).itemsize
    sub = _sublane_multiple(dtype)

    # NOTE: PE is rounded to the input dtype before the add (PyTorch would promote a
    # bf16 input to f32 instead). Acceptable for inference; documented difference.
    pe_slice = pe[:, :L, :].astype(dtype)                    # (1, L, E)

    cost = pl.CostEstimate(
        flops=B * L * E,
        transcendentals=0,
        bytes_accessed=(2 * B * L * E + L * E) * itemsize,   # read x + pe, write out
    )

    N = L * E
    if N % 128 == 0:
        # ---------------- Lane-dense path: view (L, E) as (R, 128) ----------------
        R = N // 128
        x2 = inputs.reshape(B, R, 128)
        pe2 = pe_slice.reshape(R, 128)
        per_elem_bytes = R * 128 * itemsize                  # bytes of one batch element's slab

        if per_elem_bytes < _SMALL_SLAB_BYTES and B > 1:
            # ---- Batch-spanning path: small per-batch slab, many batch elements ----
            # One block covers tile_b batch elements (MiB-scale DMA); PE stays resident
            # in VMEM via a constant index_map and broadcasts in the kernel.
            tile_b = max(1, _TARGET_BLOCK_BYTES // per_elem_bytes)
            tile_b = min(tile_b, B)
            n_b = pl.cdiv(B, tile_b)
            if n_b < 2:
                tile_b = (B + 1) // 2                        # v7x: work for both TensorCores
                n_b = pl.cdiv(B, tile_b)

            out = pl.pallas_call(
                _add_pe_kernel,
                out_shape=jax.ShapeDtypeStruct((B, R, 128), dtype),
                grid_spec=pltpu.PrefetchScalarGridSpec(
                    num_scalar_prefetch=0,
                    grid=(n_b,),
                    in_specs=[
                        pl.BlockSpec((tile_b, R, 128), lambda b: (b, 0, 0)),  # x tile
                        pl.BlockSpec((R, 128), lambda b: (0, 0)),             # PE (resident)
                    ],
                    out_specs=pl.BlockSpec((tile_b, R, 128), lambda b: (b, 0, 0)),
                ),
                compiler_params=pltpu.CompilerParams(
                    dimension_semantics=("parallel",),
                    vmem_limit_bytes=_VMEM_LIMIT_BYTES,
                ),
                cost_estimate=cost,
            )(x2, pe2)
            return out.reshape(B, L, E)

        # ---- Row-tiled path: byte-targeted tile over R, batch innermost ----
        rows_per_target = max(sub, (_TARGET_BLOCK_BYTES // (128 * itemsize)) // 32 * 32)
        tile_r = R if R <= rows_per_target else rows_per_target
        n_tiles = pl.cdiv(R, tile_r)
        if B == 1 and n_tiles == 1 and R >= 2 * sub:
            # v7x: split rows so the grid has >= 2 instances (both TensorCores busy).
            tile_r = ((R + 1) // 2 + sub - 1) // sub * sub
            n_tiles = pl.cdiv(R, tile_r)

        out = pl.pallas_call(
            _add_pe_kernel,
            out_shape=jax.ShapeDtypeStruct((B, R, 128), dtype),
            grid_spec=pltpu.PrefetchScalarGridSpec(
                num_scalar_prefetch=0,
                grid=(n_tiles, B),    # batch innermost -> PE tile reused across batch
                in_specs=[
                    pl.BlockSpec((pl.Squeezed(), tile_r, 128), lambda t, b: (b, t, 0)),  # x
                    pl.BlockSpec((tile_r, 128), lambda t, b: (t, 0)),                    # PE
                ],
                out_specs=pl.BlockSpec((pl.Squeezed(), tile_r, 128), lambda t, b: (b, t, 0)),
            ),
            compiler_params=pltpu.CompilerParams(
                dimension_semantics=("parallel", "parallel"),
                vmem_limit_bytes=_VMEM_LIMIT_BYTES,
            ),
            cost_estimate=cost,
        )(x2, pe2)
        return out.reshape(B, L, E)

    # ---------------- Fallback (L*E not a multiple of 128) ----------------
    # Last block dim equals the full E extent (legal even when E % 128 != 0); stores may
    # be partially masked in this path, but it only triggers for lane-unaligned shapes.
    # TODO(synk): if this path is ever hot, pad E to a multiple of 128 at model setup
    # instead of relying on masked (vst.msk) stores.
    pe2 = pe_slice.reshape(L, E)
    row_bytes = E * itemsize
    max_rows = max(sub, (_TARGET_BLOCK_BYTES // row_bytes) // sub * sub)  # dtype-aware rounding
    tile_l = L if L <= max_rows else max_rows
    n_tiles = pl.cdiv(L, tile_l)
    if B == 1 and n_tiles == 1 and L >= 2 * sub:
        tile_l = ((L + 1) // 2 + sub - 1) // sub * sub
        n_tiles = pl.cdiv(L, tile_l)

    return pl.pallas_call(
        _add_pe_kernel,
        out_shape=jax.ShapeDtypeStruct((B, L, E), dtype),
        grid_spec=pltpu.PrefetchScalarGridSpec(
            num_scalar_prefetch=0,
            grid=(n_tiles, B),        # batch innermost -> PE tile reused across batch
            in_specs=[
                pl.BlockSpec((pl.Squeezed(), tile_l, E), lambda t, b: (b, t, 0)),  # x
                pl.BlockSpec((tile_l, E), lambda t, b: (t, 0)),                    # PE
            ],
            out_specs=pl.BlockSpec((pl.Squeezed(), tile_l, E), lambda t, b: (b, t, 0)),
        ),
        compiler_params=pltpu.CompilerParams(
            dimension_semantics=("parallel", "parallel"),
            vmem_limit_bytes=_VMEM_LIMIT_BYTES,
        ),
        cost_estimate=cost,
    )(inputs, pe2)


if __name__ == "__main__":
    # Primary test: shapes consistent with the module's forward (batch, seq_len, embed_size).
    batch, seq_len, embed_size, max_length = 2, 8, 32, 16

    key = jax.random.PRNGKey(0)
    inputs = jax.random.normal(key, (batch, seq_len, embed_size), dtype=jnp.float32)
    pe = make_positional_encoding(embed_size, max_length)

    out = positional_embedding_forward(inputs, pe)
    out = jax.block_until_ready(out)

    ref = inputs + pe[:, :seq_len, :]
    assert out.shape == (batch, seq_len, embed_size)
    assert jnp.allclose(out, ref, atol=1e-6), "mismatch vs reference (lane-dense / batch-spanning path)"

    # Exercise the row-tiled (B == 1) lane-dense path.
    x1 = jax.random.normal(jax.random.PRNGKey(1), (1, 16, 64), dtype=jnp.float32)
    pe1 = make_positional_encoding(64, 16)
    o1 = jax.block_until_ready(positional_embedding_forward(x1, pe1))
    assert jnp.allclose(o1, x1 + pe1[:, :16, :], atol=1e-6), "mismatch vs reference (row-tiled path)"

    # Exercise the lane-unaligned fallback path (L*E % 128 != 0).
    x2 = jax.random.normal(jax.random.PRNGKey(2), (2, 8, 20), dtype=jnp.float32)
    pe2 = make_positional_encoding(20, 16)
    o2 = jax.block_until_ready(positional_embedding_forward(x2, pe2))
    assert jnp.allclose(o2, x2 + pe2[:, :8, :], atol=1e-6), "mismatch vs reference (fallback path)"

    print("KERNEL_OK")
</pallas_src>

<mosaic_0001>
module attributes {stable_mosaic.version = 11 : i64} {
  func.func @_add_pe_kernel(%arg0: i32, %arg1: memref<1x2x128xf32, #tpu.memory_space<vmem>>, %arg2: memref<2x128xf32, #tpu.memory_space<vmem>>, %arg3: memref<1x2x128xf32, #tpu.memory_space<vmem>>) attributes {dimension_semantics = [#tpu.dimension_semantics<parallel>], iteration_bounds = array<i64: 2>, scalar_prefetch = 0 : i64, scratch_operands = 0 : i64, tpu.core_type = #tpu.core_type<tc>, window_params = [{transform_indices = @transform_0, window_bounds = array<i64: 1, 2, 128>}, {pipeline_mode = #tpu.pipeline_mode<synchronous>, transform_indices = @transform_1, window_bounds = array<i64: 2, 128>}, {transform_indices = @transform_2, window_bounds = array<i64: 1, 2, 128>}]} {
    %c0 = arith.constant 0 : index
    %c0_0 = arith.constant 0 : index
    %c0_1 = arith.constant 0 : index
    %0 = vector.load %arg1[%c0, %c0_0, %c0_1] : memref<1x2x128xf32, #tpu.memory_space<vmem>>, vector<1x2x128xf32>
    %c0_2 = arith.constant 0 : index
    %c0_3 = arith.constant 0 : index
    %1 = vector.load %arg2[%c0_2, %c0_3] : memref<2x128xf32, #tpu.memory_space<vmem>>, vector<2x128xf32>
    %2 = vector.shape_cast %1 : vector<2x128xf32> to vector<1x2x128xf32>
    %3 = arith.addf %0, %2 : vector<1x2x128xf32>
    %c0_4 = arith.constant 0 : index
    %c0_5 = arith.constant 0 : index
    %c0_6 = arith.constant 0 : index
    %4 = vector.load %arg3[%c0_4, %c0_5, %c0_6] : memref<1x2x128xf32, #tpu.memory_space<vmem>>, vector<1x2x128xf32>
    tpu.vector_store %arg3[%c0_4, %c0_5, %c0_6], %3 {strides = array<i32>} : memref<1x2x128xf32, #tpu.memory_space<vmem>>, vector<1x2x128xf32>,
    return
  }
  func.func @transform_0(%arg0: i32) -> (i32, i32, i32) {
    %c0_i32 = arith.constant 0 : i32
    %c0_i32_0 = arith.constant 0 : i32
    %c0_i32_1 = arith.constant 0 : i32
    return %arg0, %c0_i32, %c0_i32_0 : i32, i32, i32
  }
  func.func @transform_1(%arg0: i32) -> (i32, i32) {
    %c0_i32 = arith.constant 0 : i32
    %c0_i32_0 = arith.constant 0 : i32
    %c0_i32_1 = arith.constant 0 : i32
    return %c0_i32, %c0_i32_0 : i32, i32
  }
  func.func @transform_2(%arg0: i32) -> (i32, i32, i32) {
    %c0_i32 = arith.constant 0 : i32
    %c0_i32_0 = arith.constant 0 : i32
    %c0_i32_1 = arith.constant 0 : i32
    return %arg0, %c0_i32, %c0_i32_0 : i32, i32, i32
  }
}

</mosaic_0001>

<bundles_post_ra>
// kernel: tpu_custom_call.1
= control target key start
LH: loop header
LB: loop body
LE: loop exit
PB: predicated region body
PF: predicated region fallthrough
CT: control target
= control target key end

     0   :  { %7 = vsyncpa [#allocation3], 0  ;;  %s649_s0 = inlined_call_operand.hbm [shape: f32[2,2,128], index: 0, kind: input, shape index: {}]   ;;  %s650_s1 = inlined_call_operand.hbm [shape: f32[2,128], index: 1, kind: input, shape index: {}]   ;;  %s651_s2 = inlined_call_operand.hbm [shape: f32[2,2,128], index: 2, kind: output, shape index: {}]  }
   0x1   :  { %9 = vsyncpa [#allocation3 + $0x1], 0 }
   0x2   :  { %10 = vsyncpa [#allocation6], 0 }
   0x3   :  { %11 = vsyncpa [#allocation4], 0 }
   0x4   :  { %13 = vsyncpa [#allocation4 + $0x1], 0  ;;  %s483_s9 = smov 0   ;;  %s485_s10 = smov 0  }
   0x5   :  { %s487_s11 = smov 0   ;;  %s489_s12 = smov 0  }
   0x6 LB: > { %s504_s13 = sadd.s32 4294967295, %s463_s12   ;;  %s270_s14 = sadd.s32 4294967294, %s463_s12   ;;  %s463_s12 = sphi %s489_s12, %s674_s12   ;;  %s459_s11 = sphi %s487_s11, %s673_s11   ;;  %s455_s10 = sphi %s485_s10, %s672_s10   ;;  %s451_s9 = sphi %s483_s9, %s671_s9  }
   0x7   : > { %p39_p0 = scmp.ne.s32.totalorder %s455_s10, %s451_s9  ;;  %p652_p1 = scmp.eq.s32.totalorder %s504_s13, 0 }
   0x8   : > { %p90_p3 = scmp.eq.s32.totalorder %s270_s14, 1  ;;  %p271_p5 = scmp.ge.s32.totalorder %s463_s12, 1 }
   0x9   : > { %p513_p4 = por %p652_p1, %p39_p0  ;;  %p97_p7 = scmp.lt.s32.totalorder %s463_s12, 3 }
   0xa   : > { %p518_p6 = por %p90_p3, %p39_p0  ;;  %s465_s18 = smov [#allocation5]  }
   0xb   : > { %s656_s15 = scalar_select %p513_p4, 1, 0 }
   0xc   : > { %s657_s16 = scalar_select %p518_p6, 1, 0 }
   0xd   : > { %p523_p8 = pnand %p271_p5, %p97_p7  ;;  %s110_s19 = sshll.u32 %s465_s18, 4  ;;  %s111_s19 = int_to_ptr.vmem [resolvable:$true] %s110_s19 }
   0xe   : > { %s531_s20 = sadd.s32 1, %s463_s12   ;;  %s26_s24 = sadd.s32 1, %s459_s11 }
   0xf   : > { %s658_s17 = scalar_select %p523_p8, 1, 0 }
  0x10   : > { %p292_p10 = pneg %p523_p8  ;;  %s23_s22 = ssub.s32 %s463_s12, %s531_s20 }
  0x11   : > { %p541_p12 = scmp.eq.s32.totalorder %s23_s22, 0  ;;  %p33_p13 = scmp.ne.s32.totalorder %s459_s11, %s455_s10 }
  0x12   : > { %p535_p11 = pnand %p292_p10, %p652_p1  ;;  %s352_s25 = scalar_lea.vmem %s111_s19, 32 }
  0x13   : > { %p353_p3 = scmp.ne.s32.totalorder %s111_s19, %s352_s25  ;;  %p360_p9 = scmp.lt.s32.totalorder %s111_s19, %s111_s19 }
  0x14   : > { %p343_p0 = pneg %p535_p11  ;;  %p361_p2 = scmp.lt.s32.totalorder %s352_s25, %s352_s25 }
  0x16   : > { %p355_p5 = pnand %p353_p3, %p343_p0  ;;  %p362_p10 = por %p361_p2, %p360_p9 }
  0x18   : > { %p356_p7 = pneg %p355_p5 }
  0x1a   : > { %p363_p1 = pnand %p362_p10, %p356_p7 }
  0x1c   : > { %366 = shalt.err (!%p363_p1)
}
  0x1d   : > { %295 = dma.hbm_to_vmem [thread:$0]  (!%p535_p11), %s650_s1, 32, %s111_s19, [#allocation6]  }
  0x1e   : > { %s558_s28 = scalar_select %p541_p12, %s459_s11, %s26_s24  }
  0x1f   : > { %p34_p1 = scmp.eq.s32.totalorder %s463_s12, 0  ;;  %p661_p2 = scmp.eq.s32.totalorder %s504_s13, 1 }
  0x20   : > { %p305_p0 = scmp.lt.s32.totalorder %s463_s12, 2  ;;  %s121_s30 = sand.u32 1, %s459_s11  }
  0x21   : > { %p566_p9 = por %p661_p2, %p33_p13  ;;  %p35_p3 = por %p34_p1, %p33_p13 }
  0x22   : > { %s274_s3 = sshll.u32 %s121_s30, 1  ;;  %s275_s4 = sshll.u32 %s463_s12, 5 }
  0x23   : > { %s662_s29 = scalar_select %p566_p9, 1, 0 }
  0x24   : > { %s579_s7 = scalar_lea.hbm %s649_s0, %s275_s4  ;;  %s125_s8 = scalar_lea.vmem [#allocation2], %s274_s3 }
  0x25   : > { %s132_s14 = sshll.u32 %s125_s8, 4  ;;  %p581_p11 = pnand %p305_p0, %p35_p3  ;;  %s133_s14 = int_to_ptr.vmem [resolvable:$true] %s132_s14 }
  0x26   : > { %s122_s19 = scalar_lea.sflag [#allocation3], %s121_s30  ;;  %s367_s21 = scalar_lea.hbm %s579_s7, 32 }
  0x27   : > { %p368_p12 = scmp.ne.s32.totalorder %s579_s7, %s367_s21  ;;  %p369_p13 = pneg %p581_p11 }
  0x28   : > { %s372_s24 = scalar_lea.hbm %s649_s0, 64  ;;  %p373_p10 = scmp.lt.s32.totalorder %s579_s7, %s649_s0 }
  0x29   : > { %p370_p5 = pnand %p369_p13, %p368_p12  ;;  %p374_p1 = scmp.lt.s32.totalorder %s372_s24, %s367_s21 }
  0x2b   : > { %p371_p7 = pneg %p370_p5  ;;  %p375_p2 = por %p374_p1, %p373_p10 }
  0x2d   : > { %p376_p0 = pnand %p375_p2, %p371_p7 }
  0x2f   : > { %379 = shalt.err (!%p376_p0)
}
  0x30   : > { %s380_s27 = scalar_lea.vmem %s133_s14, 32  ;;  %s466_s30 = smov [#allocation2]  }
  0x31   : > { %p381_p3 = scmp.ne.s32.totalorder %s133_s14, %s380_s27  ;;  %s385_s3 = sshll.u32 %s466_s30, 4  ;;  %s386_s3 = int_to_ptr.vmem [resolvable:$false] %s385_s3 }
  0x32   : > { %s387_s4 = scalar_lea.vmem %s386_s3, 64  ;;  %p388_p12 = scmp.lt.s32.totalorder %s133_s14, %s386_s3 }
  0x33   : > { %p383_p6 = pnand %p381_p3, %p369_p13  ;;  %p389_p5 = scmp.lt.s32.totalorder %s387_s4, %s380_s27 }
  0x35   : > { %p384_p9 = pneg %p383_p6  ;;  %p390_p4 = por %p389_p5, %p388_p12 }
  0x37   : > { %p391_p8 = pnand %p390_p4, %p384_p9 }
  0x39   : > { %394 = shalt.err (!%p391_p8)
}
  0x3a   : > { %299 = dma.hbm_to_vmem [thread:$0]  (!%p581_p11), %s579_s7, 32, %s133_s14, %s122_s19  }
  0x3b   : > { %p664_p7 = scmp.ne.s32.totalorder %s658_s17, 0 }
  0x3c   : > { %s602_s5 = sand.u32 (!%p664_p7), 1, %s455_s10   ;;  %p665_p6 = scmp.ne.s32.totalorder (!%p664_p7), %s656_s15, 0 }
  0x3d   : > { %141 = sbr.rel (%p664_p7) target bundleno = 95 (0x5f), region = 28  ;;  %s277_s6 = sshll.u32 (!%p664_p7), %s602_s5, 1 }
  0x3e   : > { %s144_s8 = scalar_lea.sflag (!%p664_p7), [#allocation3], %s602_s5  ;;  %s147_s21 = scalar_lea.vmem (!%p664_p7), [#allocation2], %s277_s6 }
  0x42   : > { %438 = dma.done.wait (%p665_p6), %s144_s8, 32  }
  0x43   : > { %440 = vsyncadd (%p665_p6), %s144_s8, 4294967264  ;;  %p666_p4 = scmp.eq.s32.totalorder %s504_s13, 0 }
  0x45   : > { %442 = dma.done.wait (%p666_p4), [#allocation6], 32   ;;  %p667_p8 = pmov %p666_p4 }
  0x46   : > { %s171_s17 = scalar_lea.vmem [#allocation7], %s277_s6  ;;  %s281_s14 = sshll.u32 %s504_s13, 5  ;;  %v172_v0 = vld [vmem:[%s147_s21] sm:$0x3]  ;;  %v173_v1 = vld [vmem:[#allocation5] sm:$0x3] }
  0x47   : > { %444 = vsyncadd (%p667_p8), [#allocation6], 4294967264  ;;  %s190_s7 = sshll.u32 %s171_s17, 4  ;;  %v174_v2 = vadd.f32 %v173_v1, %v172_v0  ;;  %s188_s15 = scalar_lea.hbm %s651_s2, %s281_s14  ;;  %s191_s7 = int_to_ptr.vmem [resolvable:$true] %s190_s7 }
  0x48   : > { %s177_s22 = scalar_lea.sflag [#allocation4], %s602_s5  ;;  %s395_s23 = scalar_lea.vmem %s191_s7, 32 }
  0x49   : > { %175 = vst [vmem:[%s171_s17] sm:$0x3] %v174_v2  ;;  %p396_p9 = scmp.ne.s32.totalorder %s191_s7, %s395_s23  ;;  %p668_p11 = scmp.ne.s32.totalorder %s662_s29, 0 }
  0x4a   : > { %s467_s24 = smov [#allocation7]  }
  0x4b   : > { %p397_p13 = pnand %p396_p9, %p668_p11  ;;  %s399_s25 = sshll.u32 %s467_s24, 4  ;;  %s400_s25 = int_to_ptr.vmem [resolvable:$false] %s399_s25 }
  0x4c   : > { %s401_s26 = scalar_lea.vmem %s400_s25, 64  ;;  %p402_p1 = scmp.lt.s32.totalorder %s191_s7, %s400_s25 }
  0x4d   : > { %p398_p10 = pneg %p397_p13  ;;  %p403_p2 = scmp.lt.s32.totalorder %s401_s26, %s395_s23 }
  0x4f   : > { %p404_p0 = por %p403_p2, %p402_p1 }
  0x51   : > { %p405_p3 = pnand %p404_p0, %p398_p10 }
  0x53   : > { %408 = shalt.err (!%p405_p3)
}
  0x54   : > { %s409_s13 = scalar_lea.hbm %s188_s15, 32  ;;  %s413_s3 = scalar_lea.hbm %s651_s2, 64 }
  0x55   : > { %p410_p12 = scmp.ne.s32.totalorder %s188_s15, %s409_s13  ;;  %p414_p6 = scmp.lt.s32.totalorder %s188_s15, %s651_s2 }
  0x56   : > { %p415_p4 = scmp.lt.s32.totalorder %s413_s3, %s409_s13 }
  0x57   : > { %p411_p5 = pnand %p410_p12, %p668_p11 }
  0x58   : > { %p416_p8 = por %p415_p4, %p414_p6 }
  0x59   : > { %p412_p7 = pneg %p411_p5 }
  0x5b   : > { %p417_p9 = pnand %p416_p8, %p412_p7 }
  0x5d   : > { %420 = shalt.err (!%p417_p9)
}
  0x5e   : > { %290 = dma.vmem_to_hbm [thread:$0]  (%p668_p11), %s191_s7, 32, %s188_s15, %s177_s22  }
  0x5f PF: > { %s202_s6 = sand.u32 1, %s451_s9   ;;  %p669_p13 = scmp.ne.s32.totalorder %s657_s16, 0 }
  0x60   : > { %p670_p10 = scmp.ge.s32.totalorder %s463_s12, 2  ;;  %s203_s8 = scalar_lea.sflag [#allocation4], %s202_s6 }
  0x62   : > { %p301_p1 = pnand %p670_p10, %p669_p13 }
  0x64   : > { %p302_p2 = pneg %p301_p1 }
  0x66   : > { %446 = dma.done.wait (%p302_p2), %s203_s8, 32  }
  0x67   : > { %448 = vsyncadd (%p302_p2), %s203_s8, 4294967264  ;;  %p16_p0 = scmp.ge.s32.totalorder %s531_s20, 4   ;;  %s671_s9 = smov %s455_s10 }
  0x68   : > { %s672_s10 = smov %s459_s11  ;;  %s673_s11 = smov %s558_s28 }
  0x69   : > { %s674_s12 = smov %s531_s20  ;;  %18 = sbr.rel (!%p16_p0) target bundleno = 6 (0x6), region = 77 }
  0x6e   :  { %208 = vsyncpa [#allocation3], 1 }
  0x6f   :  { %210 = vsyncpa [#allocation3 + $0x1], 1 }
  0x70   :  { %211 = vsyncpa [#allocation6], 1 }
  0x71   :  { %212 = vsyncpa [#allocation4], 1 }
  0x72   :  { %214 = vsyncpa [#allocation4 + $0x1], 1 }

</bundles_post_ra>
